<compile_context>
chip_gen: v6e
topology: v6e:2x2x1
jax: 0.10.0
libtpu: 0.0.40
codegen_flags: <defaults>
</compile_context>

<pallas_src>
import functools

import numpy as np
import jax
import jax.numpy as jnp
from jax import lax
from jax.experimental import pallas as pl
from jax.experimental.pallas import tpu as pltpu


# ----------------------------------------------------------------------------
# Pallas kernels
# ----------------------------------------------------------------------------

def _chain_kernel(x_ref, g_ref, p_ref, o_ref):
    # x: (P, L) lane-dense view of (N*C, H*W); g, p: (1, L) broadcast over planes.
    x0 = jnp.clip(x_ref[...], 0.0, 1.0)               # initial clamp (+ perspective passthrough)
    x1 = jnp.clip(x0 * g_ref[...], 0.0, 1.0)          # illumination
    o_ref[...] = jnp.clip(x1 + p_ref[...], 0.0, 1.0)  # moire


def _chain_individual_kernel(x_ref, g_ref, p_ref,
                             o_chain, o_persp, o_illum, o_moire):
    # Same fused chain, also emitting each augmentation applied to the (clamped)
    # original image — one HBM read, four writes.
    x0 = jnp.clip(x_ref[...], 0.0, 1.0)
    g = g_ref[...]
    p = p_ref[...]
    illum = jnp.clip(x0 * g, 0.0, 1.0)
    o_persp[...] = x0                                   # perspective = passthrough clamp
    o_illum[...] = illum
    o_moire[...] = jnp.clip(x0 + p, 0.0, 1.0)
    o_chain[...] = jnp.clip(illum + p, 0.0, 1.0)


def _jpeg_core(x, dm, dw, q, iq):
    # x : (TM, W) image rows in [0, 1]
    # dm: (TM, TM) = kron(I_{TM/8}, D8)   (block-diagonal row DCT)
    # dw: (W, W)   = kron(I_{W/8},  D8)   (block-diagonal col DCT)
    # q : (TM, W) tiled 8x8 quantization table, iq = 1/q (precomputed on host).
    y = x * 255.0 - 128.0
    f32 = jnp.float32
    a = lax.dot_general(y, dw, (((1,), (1,)), ((), ())),
                        preferred_element_type=f32)          # y @ DW^T
    coeff = lax.dot_general(dm, a, (((1,), (0,)), ((), ())),
                            preferred_element_type=f32)      # DM @ (y @ DW^T)
    cq = jnp.round(coeff * iq) * q                           # quantize / dequantize
    d = lax.dot_general(cq, dw, (((1,), (0,)), ((), ())),
                        preferred_element_type=f32)          # cq @ DW
    rec = lax.dot_general(dm, d, (((0,), (0,)), ((), ())),
                          preferred_element_type=f32)        # DM^T @ (cq @ DW)
    return jnp.clip(rec * (1.0 / 255.0) + (128.0 / 255.0), 0.0, 1.0)


def _jpeg_kernel(x_ref, dm_ref, dw_ref, q_ref, iq_ref, o_ref):
    # x_ref/o_ref: (1, TM, W) per-plane row tile.
    o_ref[0] = _jpeg_core(x_ref[0], dm_ref[...], dw_ref[...],
                          q_ref[...], iq_ref[...])


def _fused_full_kernel(x_ref, g_ref, p_ref, dm_ref, dw_ref, q_ref, iq_ref, o_ref):
    # Whole forward in one shot: clamp -> (*gain) -> clamp -> (+pattern) -> clamp -> jpeg.
    x0 = jnp.clip(x_ref[0], 0.0, 1.0)
    chain = jnp.clip(jnp.clip(x0 * g_ref[...], 0.0, 1.0) + p_ref[...], 0.0, 1.0)
    o_ref[0] = _jpeg_core(chain, dm_ref[...], dw_ref[...], q_ref[...], iq_ref[...])


def _fused_full_individual_kernel(x_ref, g_ref, p_ref, dm_ref, dw_ref, q_ref, iq_ref,
                                  o_comb, o_jpeg, o_persp, o_illum, o_moire):
    # One HBM read of the image; five writes (combine, jpeg(orig), perspective,
    # illumination, moire).  DCT / quant constants are shared by both jpeg streams.
    x0 = jnp.clip(x_ref[0], 0.0, 1.0)
    g = g_ref[...]
    p = p_ref[...]
    dm = dm_ref[...]
    dw = dw_ref[...]
    q = q_ref[...]
    iq = iq_ref[...]
    illum = jnp.clip(x0 * g, 0.0, 1.0)
    chain = jnp.clip(illum + p, 0.0, 1.0)
    o_persp[0] = x0
    o_illum[0] = illum
    o_moire[0] = jnp.clip(x0 + p, 0.0, 1.0)
    o_comb[0] = _jpeg_core(chain, dm, dw, q, iq)
    o_jpeg[0] = _jpeg_core(x0, dm, dw, q, iq)


# ----------------------------------------------------------------------------
# Tiling helpers
# ----------------------------------------------------------------------------

def _pick_lane_tile(total, cap=32768):
    """Largest lane tile (multiple of 128 when possible) dividing `total`."""
    if total <= cap:
        return total
    best = None
    t = 128
    while t <= cap:
        if total % t == 0:
            best = t
        t += 128
    return best if best is not None else total


def _pick_row_tile(height, cap=256):
    """Largest multiple-of-8 row tile that divides `height`, capped (bounds the
    (TM, TM) DCT matrix and per-step VMEM footprint; important on v7x)."""
    assert height % 8 == 0
    cap = min(cap, height)
    best = 8
    for t in range(8, cap + 1, 8):
        if height % t == 0:
            best = t
    return best


# ----------------------------------------------------------------------------
# pallas_call wrappers
# ----------------------------------------------------------------------------

def _fused_chain_call(img, gain, pattern, return_individual):
    """clamp -> (*gain) -> clamp -> (+pattern) -> clamp, fused into one kernel.

    Runs on a lane-dense (N*C, H*W) view; gain/pattern are broadcast over planes.
    Used when no jpeg augmentation is configured.
    """
    N, C, H, W = img.shape
    P, L = N * C, H * W
    x = img.reshape(P, L).astype(jnp.float32)
    g = gain.reshape(1, L).astype(jnp.float32)
    p = pattern.reshape(1, L).astype(jnp.float32)

    TL = _pick_lane_tile(L)
    grid = (L // TL,)
    x_spec = pl.BlockSpec((P, TL), lambda j: (0, j))
    gp_spec = pl.BlockSpec((1, TL), lambda j: (0, j))
    out_sds = jax.ShapeDtypeStruct((P, L), jnp.float32)
    params = pltpu.CompilerParams(dimension_semantics=("parallel",))

    if return_individual:
        outs = pl.pallas_call(
            _chain_individual_kernel,
            out_shape=(out_sds, out_sds, out_sds, out_sds),
            grid=grid,
            in_specs=[x_spec, gp_spec, gp_spec],
            out_specs=(x_spec, x_spec, x_spec, x_spec),
            compiler_params=params,
        )(x, g, p)
        return tuple(o.reshape(N, C, H, W) for o in outs)  # (chain, persp, illum, moire)

    out = pl.pallas_call(
        _chain_kernel,
        out_shape=out_sds,
        grid=grid,
        in_specs=[x_spec, gp_spec, gp_spec],
        out_specs=x_spec,
        compiler_params=params,
    )(x, g, p)
    return out.reshape(N, C, H, W)


def _fused_full_call(img, gain, pattern, jpeg, return_individual):
    """Single pallas_call for the whole forward when a jpeg aug is present."""
    N, C, H, W = img.shape
    assert H % 8 == 0 and W % 8 == 0, "JPEG path requires H, W multiples of 8"
    P = N * C
    x = img.reshape(P, H, W).astype(jnp.float32)
    g = gain.reshape(H, W).astype(jnp.float32)
    p = pattern.reshape(H, W).astype(jnp.float32)

    TM = _pick_row_tile(H, jpeg.row_tile_cap)
    dm, dw, q, iq = jpeg._constants(TM, W)
    grid = (P, H // TM)

    x_spec = pl.BlockSpec((1, TM, W), lambda b, r: (b, r, 0))
    gp_spec = pl.BlockSpec((TM, W), lambda b, r: (r, 0))
    dm_spec = pl.BlockSpec((TM, TM), lambda b, r: (0, 0))
    dw_spec = pl.BlockSpec((W, W), lambda b, r: (0, 0))
    q_spec = pl.BlockSpec((TM, W), lambda b, r: (0, 0))
    out_sds = jax.ShapeDtypeStruct((P, H, W), jnp.float32)
    params = pltpu.CompilerParams(dimension_semantics=("parallel", "parallel"))
    in_specs = [x_spec, gp_spec, gp_spec, dm_spec, dw_spec, q_spec, q_spec]

    if return_individual:
        outs = pl.pallas_call(
            _fused_full_individual_kernel,
            out_shape=(out_sds,) * 5,
            grid=grid,
            in_specs=in_specs,
            out_specs=(x_spec,) * 5,
            compiler_params=params,
        )(x, g, p, dm, dw, q, iq)
        # (combine, jpeg_orig, perspective, illumination, moire)
        return tuple(o.reshape(N, C, H, W) for o in outs)

    out = pl.pallas_call(
        _fused_full_kernel,
        out_shape=out_sds,
        grid=grid,
        in_specs=in_specs,
        out_specs=x_spec,
        compiler_params=params,
    )(x, g, p, dm, dw, q, iq)
    return out.reshape(N, C, H, W)


class JpegAug:
    """Blockwise-DCT 'jpeg' augmentation.  Holds the cached kron(I, D8) / quant
    constants used by both the standalone call and the fully fused forward."""

    def __init__(self, d8, q8, row_tile_cap=256):
        self.d8 = np.asarray(d8, np.float32)
        self.q8 = np.asarray(q8, np.float32)
        self.row_tile_cap = row_tile_cap
        self._const_cache = {}

    def _constants(self, tm, w):
        key = (tm, w)
        if key not in self._const_cache:
            dm = np.kron(np.eye(tm // 8, dtype=np.float32), self.d8).astype(np.float32)
            dw = np.kron(np.eye(w // 8, dtype=np.float32), self.d8).astype(np.float32)
            q = np.tile(self.q8, (tm // 8, w // 8)).astype(np.float32)
            iq = (1.0 / q).astype(np.float32)
            self._const_cache[key] = (jnp.asarray(dm), jnp.asarray(dw),
                                      jnp.asarray(q), jnp.asarray(iq))
        return self._const_cache[key]

    def __call__(self, img):
        # Standalone jpeg (not used by the fused Augmenter path, kept for parity
        # with a config that only injects 'jpeg').
        N, C, H, W = img.shape
        assert H % 8 == 0 and W % 8 == 0, "JPEG path requires H, W multiples of 8"
        P = N * C
        x = img.reshape(P, H, W).astype(jnp.float32)
        TM = _pick_row_tile(H, self.row_tile_cap)
        dm, dw, q, iq = self._constants(TM, W)
        grid = (P, H // TM)
        x_spec = pl.BlockSpec((1, TM, W), lambda b, r: (b, r, 0))
        dm_spec = pl.BlockSpec((TM, TM), lambda b, r: (0, 0))
        dw_spec = pl.BlockSpec((W, W), lambda b, r: (0, 0))
        q_spec = pl.BlockSpec((TM, W), lambda b, r: (0, 0))
        out = pl.pallas_call(
            _jpeg_kernel,
            out_shape=jax.ShapeDtypeStruct((P, H, W), jnp.float32),
            grid=grid,
            in_specs=[x_spec, dm_spec, dw_spec, q_spec, q_spec],
            out_specs=x_spec,
            compiler_params=pltpu.CompilerParams(
                dimension_semantics=("parallel", "parallel")),
        )(x, dm, dw, q, iq)
        return out.reshape(N, C, H, W)


# ----------------------------------------------------------------------------
# Synthetic augmentation callables (mirroring what the config would inject)
# ----------------------------------------------------------------------------

def make_perspective(distortion_scale=0.5, distortion_scale_bound=0.5):
    """Factory mirroring kornia-style RandomPerspective construction."""
    del distortion_scale_bound

    def transform(img, params=None):
        del params
        # TODO(synk): a true perspective warp needs a data-dependent bilinear
        # gather (grid_sample); no clean Pallas equivalent here -> passthrough clamp.
        return jnp.clip(img, 0.0, 1.0)

    transform._params = None
    transform.distortion_scale = distortion_scale
    return transform


def make_illumination(default_gain):
    def aug(img, pattern=None):
        g = default_gain if pattern is None else pattern
        H, W = img.shape[-2], img.shape[-1]
        return _fused_chain_call(img, g, jnp.zeros((H, W), img.dtype), False)
    aug.gain = default_gain
    return aug


def make_moire(default_pattern):
    def aug(img, pattern=None):
        p = default_pattern if pattern is None else pattern
        H, W = img.shape[-2], img.shape[-1]
        return _fused_chain_call(img, jnp.ones((H, W), img.dtype), p, False)
    aug.pattern = default_pattern
    return aug


def make_jpeg(d8, q8):
    return JpegAug(d8, q8)


# ----------------------------------------------------------------------------
# Augmenter (forward semantics of the PyTorch module)
# ----------------------------------------------------------------------------

_FUSED_AUGS = ('perspective', 'illumination', 'moire', 'jpeg')


class Augmenter:
    def __init__(self, aug_dict):
        self.aug_dict = aug_dict
        self.jpeg = aug_dict.get('jpeg')
        self._perspective = None

    @property
    def distortion_types(self):
        return self.aug_dict.keys()

    @property
    def perspective(self):
        return self._perspective

    def __call__(self, image, batch_idx, distortion_pattern=None,
                 return_individual=False):
        if distortion_pattern is None:
            distortion_pattern = {}
        N, C, H, W = image.shape
        dtype = image.dtype

        # perspective bookkeeping (scale schedule); the warp itself is a passthrough.
        if 'perspective' in self.aug_dict:
            p_factory = self.aug_dict['perspective']
            scale = p_factory.keywords['distortion_scale_bound'] * min(
                1.0, (batch_idx + 2) / 5000.0)
            self._perspective = p_factory(distortion_scale=scale)

        has_illum = 'illumination' in self.aug_dict
        has_moire = 'moire' in self.aug_dict
        gain = (jnp.asarray(distortion_pattern.get(
                    'illumination', self.aug_dict['illumination'].gain), dtype)
                if has_illum else jnp.ones((H, W), dtype))
        pattern = (jnp.asarray(distortion_pattern.get(
                       'moire', self.aug_dict['moire'].pattern), dtype)
                   if has_moire else jnp.zeros((H, W), dtype))

        distortion_dict = dict()

        # Fully fused forward.  The kernels clamp every stage, so the per-stage
        # clamp(0,1) calls of the reference forward are already folded in.
        # NOTE: fused path applies the augs in canonical perspective->illumination->
        # moire->jpeg order (the order the reference config uses).
        persp_ind = illum_ind = moire_ind = None
        if self.jpeg is not None:
            if return_individual:
                combined, jpeg_ind, persp_ind, illum_ind, moire_ind = _fused_full_call(
                    image, gain, pattern, self.jpeg, True)
                distortion_dict['jpeg'] = jpeg_ind
            else:
                combined = _fused_full_call(image, gain, pattern, self.jpeg, False)
        else:
            if return_individual:
                combined, persp_ind, illum_ind, moire_ind = _fused_chain_call(
                    image, gain, pattern, True)
            else:
                combined = _fused_chain_call(image, gain, pattern, False)

        # Unknown / non-fused augmentations run after the fused chain (generic path).
        for name, aug in self.aug_dict.items():
            if name in _FUSED_AUGS:
                continue
            combined = jnp.clip(aug(combined), 0.0, 1.0)
            if return_individual:
                distortion_dict[name] = jnp.clip(aug(persp_ind), 0.0, 1.0)

        if return_individual:
            if 'perspective' in self.aug_dict:
                distortion_dict['perspective'] = persp_ind
            if has_illum:
                distortion_dict['illumination'] = illum_ind
            if has_moire:
                distortion_dict['moire'] = moire_ind
        distortion_dict['combine'] = combined
        return distortion_dict


# ----------------------------------------------------------------------------
# Main
# ----------------------------------------------------------------------------

if __name__ == "__main__":
    N, C, H, W = 2, 3, 16, 16

    key = jax.random.PRNGKey(0)
    # slightly outside [0,1] to exercise the initial clamp
    image = jax.random.uniform(key, (N, C, H, W), dtype=jnp.float32,
                               minval=-0.1, maxval=1.1)

    # --- deterministic augmentation parameters (in place of a checkpoint) ----
    yy, xx = np.meshgrid(np.arange(H), np.arange(W), indexing='ij')
    cy, cx = (H - 1) / 2.0, (W - 1) / 2.0
    r = np.sqrt(((yy - cy) / H) ** 2 + ((xx - cx) / W) ** 2)
    gain = (0.75 + 0.5 * np.cos(np.pi * r)).astype(np.float32)            # (H, W)
    moire_pattern = (0.08 * np.sin(2.0 * np.pi * (3 * yy + 5 * xx) / W)
                     ).astype(np.float32)                                  # (H, W)

    # 8x8 DCT basis + JPEG luma quantization table (the kernels build the
    # block-diagonal kron(I, D8) matrices per row-tile internally).
    kk = np.arange(8)[:, None]
    nn = np.arange(8)[None, :]
    D8 = np.sqrt(2.0 / 8.0) * np.cos(np.pi * (2 * nn + 1) * kk / 16.0)
    D8[0, :] = np.sqrt(1.0 / 8.0)
    D8 = D8.astype(np.float32)
    Q8 = np.array([[16, 11, 10, 16, 24, 40, 51, 61],
                   [12, 12, 14, 19, 26, 58, 60, 55],
                   [14, 13, 16, 24, 40, 57, 69, 56],
                   [14, 17, 22, 29, 51, 87, 80, 62],
                   [18, 22, 37, 56, 68, 109, 103, 77],
                   [24, 35, 55, 64, 81, 104, 113, 92],
                   [49, 64, 78, 87, 103, 121, 120, 101],
                   [72, 92, 95, 98, 112, 100, 103, 99]], dtype=np.float32)

    aug_dict = {
        'perspective': functools.partial(make_perspective,
                                         distortion_scale_bound=0.5),
        'illumination': make_illumination(jnp.asarray(gain)),
        'moire': make_moire(jnp.asarray(moire_pattern)),
        'jpeg': make_jpeg(D8, Q8),
    }

    augmenter = Augmenter(aug_dict)
    out = augmenter(image, batch_idx=3, return_individual=True)

    for leaf in jax.tree_util.tree_leaves(out):
        jax.block_until_ready(leaf)

    combine = out['combine']
    assert combine.shape == (N, C, H, W)
    assert combine.dtype == jnp.float32
    assert bool(jnp.all((combine >= 0.0) & (combine <= 1.0)))
    assert set(out.keys()) == {'perspective', 'illumination', 'moire', 'jpeg',
                               'combine'}
    for k in ('perspective', 'illumination', 'moire', 'jpeg'):
        v = out[k]
        assert v.shape == (N, C, H, W)
        assert bool(jnp.all((v >= 0.0) & (v <= 1.0)))
    print("KERNEL_OK")
</pallas_src>

<mosaic_0001>
module attributes {stable_mosaic.version = 11 : i64} {
  func.func @_fused_full_individual_kernel(%arg0: i32, %arg1: i32, %arg2: memref<1x16x16xf32, #tpu.memory_space<vmem>>, %arg3: memref<16x16xf32, #tpu.memory_space<vmem>>, %arg4: memref<16x16xf32, #tpu.memory_space<vmem>>, %arg5: memref<16x16xf32, #tpu.memory_space<vmem>>, %arg6: memref<16x16xf32, #tpu.memory_space<vmem>>, %arg7: memref<16x16xf32, #tpu.memory_space<vmem>>, %arg8: memref<16x16xf32, #tpu.memory_space<vmem>>, %arg9: memref<1x16x16xf32, #tpu.memory_space<vmem>>, %arg10: memref<1x16x16xf32, #tpu.memory_space<vmem>>, %arg11: memref<1x16x16xf32, #tpu.memory_space<vmem>>, %arg12: memref<1x16x16xf32, #tpu.memory_space<vmem>>, %arg13: memref<1x16x16xf32, #tpu.memory_space<vmem>>) attributes {dimension_semantics = [#tpu.dimension_semantics<parallel>, #tpu.dimension_semantics<parallel>], iteration_bounds = array<i64: 6, 1>, scalar_prefetch = 0 : i64, scratch_operands = 0 : i64, tpu.core_type = #tpu.core_type<tc>, window_params = [{transform_indices = @transform_0, window_bounds = array<i64: 1, 16, 16>}, {transform_indices = @transform_1, window_bounds = array<i64: 16, 16>}, {transform_indices = @transform_2, window_bounds = array<i64: 16, 16>}, {pipeline_mode = #tpu.pipeline_mode<synchronous>, transform_indices = @transform_3, window_bounds = array<i64: 16, 16>}, {pipeline_mode = #tpu.pipeline_mode<synchronous>, transform_indices = @transform_4, window_bounds = array<i64: 16, 16>}, {pipeline_mode = #tpu.pipeline_mode<synchronous>, transform_indices = @transform_5, window_bounds = array<i64: 16, 16>}, {pipeline_mode = #tpu.pipeline_mode<synchronous>, transform_indices = @transform_6, window_bounds = array<i64: 16, 16>}, {transform_indices = @transform_7, window_bounds = array<i64: 1, 16, 16>}, {transform_indices = @transform_8, window_bounds = array<i64: 1, 16, 16>}, {transform_indices = @transform_9, window_bounds = array<i64: 1, 16, 16>}, {transform_indices = @transform_10, window_bounds = array<i64: 1, 16, 16>}, {transform_indices = @transform_11, window_bounds = array<i64: 1, 16, 16>}]} {
    %c0 = arith.constant 0 : index
    %c0_0 = arith.constant 0 : index
    %c0_1 = arith.constant 0 : index
    %0 = vector.load %arg2[%c0, %c0_0, %c0_1] : memref<1x16x16xf32, #tpu.memory_space<vmem>>, vector<1x16x16xf32>
    %1 = vector.shape_cast %0 : vector<1x16x16xf32> to vector<16x16xf32>
    %cst = arith.constant 0.000000e+00 : f32
    %cst_2 = arith.constant 1.000000e+00 : f32
    %2 = vector.broadcast %cst : f32 to vector<16x16xf32>
    %3 = arith.maximumf %2, %1 : vector<16x16xf32>
    %4 = vector.broadcast %cst_2 : f32 to vector<16x16xf32>
    %5 = arith.minimumf %4, %3 : vector<16x16xf32>
    %c0_3 = arith.constant 0 : index
    %c0_4 = arith.constant 0 : index
    %6 = vector.load %arg3[%c0_3, %c0_4] : memref<16x16xf32, #tpu.memory_space<vmem>>, vector<16x16xf32>
    %c0_5 = arith.constant 0 : index
    %c0_6 = arith.constant 0 : index
    %7 = vector.load %arg4[%c0_5, %c0_6] : memref<16x16xf32, #tpu.memory_space<vmem>>, vector<16x16xf32>
    %c0_7 = arith.constant 0 : index
    %c0_8 = arith.constant 0 : index
    %8 = vector.load %arg5[%c0_7, %c0_8] : memref<16x16xf32, #tpu.memory_space<vmem>>, vector<16x16xf32>
    %c0_9 = arith.constant 0 : index
    %c0_10 = arith.constant 0 : index
    %9 = vector.load %arg6[%c0_9, %c0_10] : memref<16x16xf32, #tpu.memory_space<vmem>>, vector<16x16xf32>
    %c0_11 = arith.constant 0 : index
    %c0_12 = arith.constant 0 : index
    %10 = vector.load %arg7[%c0_11, %c0_12] : memref<16x16xf32, #tpu.memory_space<vmem>>, vector<16x16xf32>
    %c0_13 = arith.constant 0 : index
    %c0_14 = arith.constant 0 : index
    %11 = vector.load %arg8[%c0_13, %c0_14] : memref<16x16xf32, #tpu.memory_space<vmem>>, vector<16x16xf32>
    %12 = arith.mulf %5, %6 : vector<16x16xf32>
    %cst_15 = arith.constant 0.000000e+00 : f32
    %cst_16 = arith.constant 1.000000e+00 : f32
    %13 = vector.broadcast %cst_15 : f32 to vector<16x16xf32>
    %14 = arith.maximumf %13, %12 : vector<16x16xf32>
    %15 = vector.broadcast %cst_16 : f32 to vector<16x16xf32>
    %16 = arith.minimumf %15, %14 : vector<16x16xf32>
    %17 = arith.addf %16, %7 : vector<16x16xf32>
    %cst_17 = arith.constant 0.000000e+00 : f32
    %cst_18 = arith.constant 1.000000e+00 : f32
    %18 = vector.broadcast %cst_17 : f32 to vector<16x16xf32>
    %19 = arith.maximumf %18, %17 : vector<16x16xf32>
    %20 = vector.broadcast %cst_18 : f32 to vector<16x16xf32>
    %21 = arith.minimumf %20, %19 : vector<16x16xf32>
    %c0_19 = arith.constant 0 : index
    %c0_20 = arith.constant 0 : index
    %c0_21 = arith.constant 0 : index
    %22 = vector.load %arg11[%c0_19, %c0_20, %c0_21] : memref<1x16x16xf32, #tpu.memory_space<vmem>>, vector<1x16x16xf32>
    %23 = vector.shape_cast %22 : vector<1x16x16xf32> to vector<16x16xf32>
    %24 = vector.shape_cast %5 : vector<16x16xf32> to vector<1x16x16xf32>
    tpu.vector_store %arg11[%c0_19, %c0_20, %c0_21], %24 {strides = array<i32>} : memref<1x16x16xf32, #tpu.memory_space<vmem>>, vector<1x16x16xf32>,
    %c0_22 = arith.constant 0 : index
    %c0_23 = arith.constant 0 : index
    %c0_24 = arith.constant 0 : index
    %25 = vector.load %arg12[%c0_22, %c0_23, %c0_24] : memref<1x16x16xf32, #tpu.memory_space<vmem>>, vector<1x16x16xf32>
    %26 = vector.shape_cast %25 : vector<1x16x16xf32> to vector<16x16xf32>
    %27 = vector.shape_cast %16 : vector<16x16xf32> to vector<1x16x16xf32>
    tpu.vector_store %arg12[%c0_22, %c0_23, %c0_24], %27 {strides = array<i32>} : memref<1x16x16xf32, #tpu.memory_space<vmem>>, vector<1x16x16xf32>,
    %28 = arith.addf %5, %7 : vector<16x16xf32>
    %cst_25 = arith.constant 0.000000e+00 : f32
    %cst_26 = arith.constant 1.000000e+00 : f32
    %29 = vector.broadcast %cst_25 : f32 to vector<16x16xf32>
    %30 = arith.maximumf %29, %28 : vector<16x16xf32>
    %31 = vector.broadcast %cst_26 : f32 to vector<16x16xf32>
    %32 = arith.minimumf %31, %30 : vector<16x16xf32>
    %c0_27 = arith.constant 0 : index
    %c0_28 = arith.constant 0 : index
    %c0_29 = arith.constant 0 : index
    %33 = vector.load %arg13[%c0_27, %c0_28, %c0_29] : memref<1x16x16xf32, #tpu.memory_space<vmem>>, vector<1x16x16xf32>
    %34 = vector.shape_cast %33 : vector<1x16x16xf32> to vector<16x16xf32>
    %35 = vector.shape_cast %32 : vector<16x16xf32> to vector<1x16x16xf32>
    tpu.vector_store %arg13[%c0_27, %c0_28, %c0_29], %35 {strides = array<i32>} : memref<1x16x16xf32, #tpu.memory_space<vmem>>, vector<1x16x16xf32>,
    %cst_30 = arith.constant 2.550000e+02 : f32
    %36 = vector.broadcast %cst_30 : f32 to vector<16x16xf32>
    %37 = arith.mulf %21, %36 : vector<16x16xf32>
    %cst_31 = arith.constant 1.280000e+02 : f32
    %38 = vector.broadcast %cst_31 : f32 to vector<16x16xf32>
    %39 = arith.subf %37, %38 : vector<16x16xf32>
    %cst_32 = arith.constant dense<0.000000e+00> : vector<16x16xf32>
    %40 = tpu.matmul %39, %9, %cst_32 {dimension_numbers = #tpu.dot_dimension_numbers<[1], [1], [0], [0], [0, 0, 1, 0], [], []>} : vector<16x16xf32>, vector<16x16xf32>, vector<16x16xf32> -> vector<16x16xf32>
    %cst_33 = arith.constant dense<0.000000e+00> : vector<16x16xf32>
    %41 = tpu.matmul %8, %40, %cst_33 {dimension_numbers = #tpu.dot_dimension_numbers<[1], [0], [0], [1], [0, 0, 1, 1], [], []>} : vector<16x16xf32>, vector<16x16xf32>, vector<16x16xf32> -> vector<16x16xf32>
    %42 = arith.mulf %41, %11 : vector<16x16xf32>
    %43 = math.roundeven %42 : vector<16x16xf32>
    %44 = arith.mulf %43, %10 : vector<16x16xf32>
    %cst_34 = arith.constant dense<0.000000e+00> : vector<16x16xf32>
    %45 = tpu.matmul %44, %9, %cst_34 {dimension_numbers = #tpu.dot_dimension_numbers<[1], [0], [0], [1], [0, 0, 1, 1], [], []>} : vector<16x16xf32>, vector<16x16xf32>, vector<16x16xf32> -> vector<16x16xf32>
    %cst_35 = arith.constant dense<0.000000e+00> : vector<16x16xf32>
    %46 = tpu.matmul %8, %45, %cst_35 {dimension_numbers = #tpu.dot_dimension_numbers<[0], [0], [1], [1], [0, 1, 1, 1], [], []>} : vector<16x16xf32>, vector<16x16xf32>, vector<16x16xf32> -> vector<16x16xf32>
    %cst_36 = arith.constant 0.00392156886 : f32
    %47 = vector.broadcast %cst_36 : f32 to vector<16x16xf32>
    %48 = arith.mulf %46, %47 : vector<16x16xf32>
    %cst_37 = arith.constant 0.501960814 : f32
    %49 = vector.broadcast %cst_37 : f32 to vector<16x16xf32>
    %50 = arith.addf %48, %49 : vector<16x16xf32>
    %cst_38 = arith.constant 0.000000e+00 : f32
    %cst_39 = arith.constant 1.000000e+00 : f32
    %51 = vector.broadcast %cst_38 : f32 to vector<16x16xf32>
    %52 = arith.maximumf %51, %50 : vector<16x16xf32>
    %53 = vector.broadcast %cst_39 : f32 to vector<16x16xf32>
    %54 = arith.minimumf %53, %52 : vector<16x16xf32>
    %c0_40 = arith.constant 0 : index
    %c0_41 = arith.constant 0 : index
    %c0_42 = arith.constant 0 : index
    %55 = vector.load %arg9[%c0_40, %c0_41, %c0_42] : memref<1x16x16xf32, #tpu.memory_space<vmem>>, vector<1x16x16xf32>
    %56 = vector.shape_cast %55 : vector<1x16x16xf32> to vector<16x16xf32>
    %57 = vector.shape_cast %54 : vector<16x16xf32> to vector<1x16x16xf32>
    tpu.vector_store %arg9[%c0_40, %c0_41, %c0_42], %57 {strides = array<i32>} : memref<1x16x16xf32, #tpu.memory_space<vmem>>, vector<1x16x16xf32>,
    %cst_43 = arith.constant 2.550000e+02 : f32
    %58 = vector.broadcast %cst_43 : f32 to vector<16x16xf32>
    %59 = arith.mulf %5, %58 : vector<16x16xf32>
    %cst_44 = arith.constant 1.280000e+02 : f32
    %60 = vector.broadcast %cst_44 : f32 to vector<16x16xf32>
    %61 = arith.subf %59, %60 : vector<16x16xf32>
    %cst_45 = arith.constant dense<0.000000e+00> : vector<16x16xf32>
    %62 = tpu.matmul %61, %9, %cst_45 {dimension_numbers = #tpu.dot_dimension_numbers<[1], [1], [0], [0], [0, 0, 1, 0], [], []>} : vector<16x16xf32>, vector<16x16xf32>, vector<16x16xf32> -> vector<16x16xf32>
    %cst_46 = arith.constant dense<0.000000e+00> : vector<16x16xf32>
    %63 = tpu.matmul %8, %62, %cst_46 {dimension_numbers = #tpu.dot_dimension_numbers<[1], [0], [0], [1], [0, 0, 1, 1], [], []>} : vector<16x16xf32>, vector<16x16xf32>, vector<16x16xf32> -> vector<16x16xf32>
    %64 = arith.mulf %63, %11 : vector<16x16xf32>
    %65 = math.roundeven %64 : vector<16x16xf32>
    %66 = arith.mulf %65, %10 : vector<16x16xf32>
    %cst_47 = arith.constant dense<0.000000e+00> : vector<16x16xf32>
    %67 = tpu.matmul %66, %9, %cst_47 {dimension_numbers = #tpu.dot_dimension_numbers<[1], [0], [0], [1], [0, 0, 1, 1], [], []>} : vector<16x16xf32>, vector<16x16xf32>, vector<16x16xf32> -> vector<16x16xf32>
    %cst_48 = arith.constant dense<0.000000e+00> : vector<16x16xf32>
    %68 = tpu.matmul %8, %67, %cst_48 {dimension_numbers = #tpu.dot_dimension_numbers<[0], [0], [1], [1], [0, 1, 1, 1], [], []>} : vector<16x16xf32>, vector<16x16xf32>, vector<16x16xf32> -> vector<16x16xf32>
    %cst_49 = arith.constant 0.00392156886 : f32
    %69 = vector.broadcast %cst_49 : f32 to vector<16x16xf32>
    %70 = arith.mulf %68, %69 : vector<16x16xf32>
    %cst_50 = arith.constant 0.501960814 : f32
    %71 = vector.broadcast %cst_50 : f32 to vector<16x16xf32>
    %72 = arith.addf %70, %71 : vector<16x16xf32>
    %cst_51 = arith.constant 0.000000e+00 : f32
    %cst_52 = arith.constant 1.000000e+00 : f32
    %73 = vector.broadcast %cst_51 : f32 to vector<16x16xf32>
    %74 = arith.maximumf %73, %72 : vector<16x16xf32>
    %75 = vector.broadcast %cst_52 : f32 to vector<16x16xf32>
    %76 = arith.minimumf %75, %74 : vector<16x16xf32>
    %c0_53 = arith.constant 0 : index
    %c0_54 = arith.constant 0 : index
    %c0_55 = arith.constant 0 : index
    %77 = vector.load %arg10[%c0_53, %c0_54, %c0_55] : memref<1x16x16xf32, #tpu.memory_space<vmem>>, vector<1x16x16xf32>
    %78 = vector.shape_cast %77 : vector<1x16x16xf32> to vector<16x16xf32>
    %79 = vector.shape_cast %76 : vector<16x16xf32> to vector<1x16x16xf32>
    tpu.vector_store %arg10[%c0_53, %c0_54, %c0_55], %79 {strides = array<i32>} : memref<1x16x16xf32, #tpu.memory_space<vmem>>, vector<1x16x16xf32>,
    return
  }
  func.func @transform_0(%arg0: i32, %arg1: i32) -> (i32, i32, i32) {
    %c0_i32 = arith.constant 0 : i32
    %c0_i32_0 = arith.constant 0 : i32
    return %arg0, %arg1, %c0_i32 : i32, i32, i32
  }
  func.func @transform_1(%arg0: i32, %arg1: i32) -> (i32, i32) {
    %c0_i32 = arith.constant 0 : i32
    %c0_i32_0 = arith.constant 0 : i32
    return %arg1, %c0_i32 : i32, i32
  }
  func.func @transform_2(%arg0: i32, %arg1: i32) -> (i32, i32) {
    %c0_i32 = arith.constant 0 : i32
    %c0_i32_0 = arith.constant 0 : i32
    return %arg1, %c0_i32 : i32, i32
  }
  func.func @transform_3(%arg0: i32, %arg1: i32) -> (i32, i32) {
    %c0_i32 = arith.constant 0 : i32
    %c0_i32_0 = arith.constant 0 : i32
    %c0_i32_1 = arith.constant 0 : i32
    return %c0_i32, %c0_i32_0 : i32, i32
  }
  func.func @transform_4(%arg0: i32, %arg1: i32) -> (i32, i32) {
    %c0_i32 = arith.constant 0 : i32
    %c0_i32_0 = arith.constant 0 : i32
    %c0_i32_1 = arith.constant 0 : i32
    return %c0_i32, %c0_i32_0 : i32, i32
  }
  func.func @transform_5(%arg0: i32, %arg1: i32) -> (i32, i32) {
    %c0_i32 = arith.constant 0 : i32
    %c0_i32_0 = arith.constant 0 : i32
    %c0_i32_1 = arith.constant 0 : i32
    return %c0_i32, %c0_i32_0 : i32, i32
  }
  func.func @transform_6(%arg0: i32, %arg1: i32) -> (i32, i32) {
    %c0_i32 = arith.constant 0 : i32
    %c0_i32_0 = arith.constant 0 : i32
    %c0_i32_1 = arith.constant 0 : i32
    return %c0_i32, %c0_i32_0 : i32, i32
  }
  func.func @transform_7(%arg0: i32, %arg1: i32) -> (i32, i32, i32) {
    %c0_i32 = arith.constant 0 : i32
    %c0_i32_0 = arith.constant 0 : i32
    return %arg0, %arg1, %c0_i32 : i32, i32, i32
  }
  func.func @transform_8(%arg0: i32, %arg1: i32) -> (i32, i32, i32) {
    %c0_i32 = arith.constant 0 : i32
    %c0_i32_0 = arith.constant 0 : i32
    return %arg0, %arg1, %c0_i32 : i32, i32, i32
  }
  func.func @transform_9(%arg0: i32, %arg1: i32) -> (i32, i32, i32) {
    %c0_i32 = arith.constant 0 : i32
    %c0_i32_0 = arith.constant 0 : i32
    return %arg0, %arg1, %c0_i32 : i32, i32, i32
  }
  func.func @transform_10(%arg0: i32, %arg1: i32) -> (i32, i32, i32) {
    %c0_i32 = arith.constant 0 : i32
    %c0_i32_0 = arith.constant 0 : i32
    return %arg0, %arg1, %c0_i32 : i32, i32, i32
  }
  func.func @transform_11(%arg0: i32, %arg1: i32) -> (i32, i32, i32) {
    %c0_i32 = arith.constant 0 : i32
    %c0_i32_0 = arith.constant 0 : i32
    return %arg0, %arg1, %c0_i32 : i32, i32, i32
  }
}

</mosaic_0001>

<bundles_post_ra>
// kernel: tpu_custom_call.1
= control target key start
LH: loop header
LB: loop body
LE: loop exit
PB: predicated region body
PF: predicated region fallthrough
CT: control target
= control target key end

     0   :  { %s3033_s0 = inlined_call_operand.hbm [shape: f32[6,16,16], index: 0, kind: input, shape index: {}]   ;;  %s3034_s1 = inlined_call_operand.hbm [shape: f32[16,16], index: 1, kind: input, shape index: {}]   ;;  %s3035_s2 = inlined_call_operand.hbm [shape: f32[16,16], index: 2, kind: input, shape index: {}]   ;;  %s3036_s3 = inlined_call_operand.hbm [shape: f32[16,16], index: 3, kind: input, shape index: {}]   ;;  %s3037_s4 = inlined_call_operand.hbm [shape: f32[16,16], index: 4, kind: input, shape index: {}]   ;;  %s3038_s5 = inlined_call_operand.hbm [shape: f32[16,16], index: 5, kind: input, shape index: {}]   ;;  %s3039_s6 = inlined_call_operand.hbm [shape: f32[16,16], index: 6, kind: input, shape index: {}]   ;;  %s3040_s7 = inlined_call_operand.hbm [shape: f32[6,16,16], index: 7, kind: output, shape index: {0}]   ;;  %s3041_s8 = inlined_call_operand.hbm [shape: f32[6,16,16], index: 8, kind: output, shape index: {1}]   ;;  %s3042_s9 = inlined_call_operand.hbm [shape: f32[6,16,16], index: 9, kind: output, shape index: {2}]   ;;  %s3043_s10 = inlined_call_operand.hbm [shape: f32[6,16,16], index: 10, kind: output, shape index: {3}]   ;;  %s3044_s11 = inlined_call_operand.hbm [shape: f32[6,16,16], index: 11, kind: output, shape index: {4}]  }
   0x1   :  { %3054 = sst [smem:[#allocation29_spill]] %s3033_s0 }
   0x2   :  { %3055 = sst [smem:[#allocation30_spill]] %s3034_s1 }
   0x3   :  { %3056 = sst [smem:[#allocation31_spill]] %s3035_s2 }
   0x4   :  { %3057 = sst [smem:[#allocation32_spill]] %s3036_s3 }
   0x5   :  { %3058 = sst [smem:[#allocation33_spill]] %s3037_s4 }
   0x6   :  { %3059 = sst [smem:[#allocation34_spill]] %s3038_s5 }
   0x7   :  { %3060 = sst [smem:[#allocation35_spill]] %s3039_s6 }
   0x8   :  { %3061 = sst [smem:[#allocation36_spill]] %s3042_s9 }
   0x9   :  { %17 = vsyncpa [#allocation3], 0 }
   0xa   :  { %19 = vsyncpa [#allocation3 + $0x1], 0 }
   0xb   :  { %20 = vsyncpa [#allocation6], 0 }
   0xc   :  { %21 = vsyncpa [#allocation9], 0 }
   0xd   :  { %22 = vsyncpa [#allocation12], 0 }
   0xe   :  { %23 = vsyncpa [#allocation4], 0 }
   0xf   :  { %25 = vsyncpa [#allocation4 + $0x1], 0 }
  0x10   :  { %26 = vsyncpa [#allocation16], 0 }
  0x11   :  { %28 = vsyncpa [#allocation16 + $0x1], 0 }
  0x12   :  { %29 = vsyncpa [#allocation19], 0 }
  0x13   :  { %31 = vsyncpa [#allocation19 + $0x1], 0  ;;  %s2531_s17 = smov 0   ;;  %s2533_s18 = smov 0  }
  0x14   :  { %s2535_s19 = smov 0   ;;  %s2537_s20 = smov 0  }
  0x15   :  { %s2539_s21 = smov 0   ;;  %s2541_s22 = smov 0  }
  0x16 LB: > { %s2562_s23 = sadd.s32 4294967295, %s2453_s22   ;;  %p1726_p0 = scmp.ge.s32.totalorder %s2453_s22, 1  ;;  %s2453_s22 = sphi %s2541_s22, %s37_s22   ;;  %s2449_s21 = sphi %s2539_s21, %s3095_s21   ;;  %s2445_s20 = sphi %s2537_s20, %s3094_s20   ;;  %s2441_s19 = sphi %s2535_s19, %s3093_s19   ;;  %s2437_s18 = sphi %s2533_s18, %s3092_s18   ;;  %s2433_s17 = sphi %s2531_s17, %s3091_s17  }
  0x17   : > { %p3050_p1 = scmp.eq.s32.totalorder %s2562_s23, 0  ;;  %p358_p2 = scmp.lt.s32.totalorder %s2453_s22, 7 }
  0x18   : > { %s2455_s25 = smov [#allocation5]   ;;  %s2456_s28 = smov [#allocation8]  }
  0x19   : > { %p2567_p3 = pnand %p1726_p0, %p358_p2  ;;  %s373_s26 = sshll.u32 %s2455_s25, 4  ;;  %s374_s26 = int_to_ptr.vmem [resolvable:$true] %s373_s26 }
  0x1a   : > { %s402_s29 = sshll.u32 %s2456_s28, 4  ;;  %s2457_s30 = smov [#allocation11]   ;;  %s403_s29 = int_to_ptr.vmem [resolvable:$true] %s402_s29 }
  0x1b   : > { %p1953_p4 = pneg %p2567_p3  ;;  %s428_s12 = sshll.u32 %s2457_s30, 4  ;;  %s429_s12 = int_to_ptr.vmem [resolvable:$true] %s428_s12 }
  0x1c   : > { %s2076_s14 = scalar_lea.vmem %s374_s26, 256  ;;  %p2084_p10 = scmp.lt.s32.totalorder %s374_s26, %s374_s26 }
  0x1d   : > { %p2575_p5 = pnand %p1953_p4, %p3050_p1  ;;  %p2077_p7 = scmp.ne.s32.totalorder %s374_s26, %s2076_s14 }
  0x1e   : > { %p2085_p11 = scmp.lt.s32.totalorder %s2076_s14, %s2076_s14 }
  0x1f   : > { %p2581_p6 = pneg %p2575_p5 }
  0x20   : > { %p2086_p12 = por %p2085_p11, %p2084_p10 }
  0x21   : > { %p2079_p8 = pnand %p2077_p7, %p2581_p6 }
  0x23   : > { %p2080_p9 = pneg %p2079_p8 }
  0x25   : > { %p2087_p13 = pnand %p2086_p12, %p2080_p9 }
  0x27   : > { %2090 = shalt.err (!%p2087_p13)
}
  0x28   : > { %s3046_s15 = smov 128   ;;  %s3047_s16 = smov 8  }
  0x29   : > { %s3065_s1 = sld [smem:[#allocation30_spill]]  ;;  %s2102_s30 = scalar_lea.vmem %s403_s29, 256 }
  0x2a   : > { %p2103_p0 = scmp.ne.s32.totalorder %s403_s29, %s2102_s30  ;;  %p2110_p7 = scmp.lt.s32.totalorder %s403_s29, %s403_s29 }
  0x2b   : > { %p2111_p8 = scmp.lt.s32.totalorder %s2102_s30, %s2102_s30 }
  0x2c   : > { %p2105_p2 = pnand %p2103_p0, %p2581_p6 }
  0x2d   : > { %p2112_p9 = por %p2111_p8, %p2110_p7 }
  0x2e   : > { %p2106_p4 = pneg %p2105_p2 }
  0x2f   : > { %1956 = dma.hbm_to_vmem [thread:$0]  (!%p2575_p5), %s3065_s1, 256, %s374_s26, [#allocation6], %s3046_s15, %s3046_s15, %s3047_s16  }
  0x30   : > { %p2113_p10 = pnand %p2112_p9, %p2106_p4 }
  0x32   : > { %2116 = shalt.err (!%p2113_p10)
}
  0x33   : > { %s3066_s3 = sld [smem:[#allocation32_spill]]  ;;  %s2128_s26 = scalar_lea.vmem %s429_s12, 256 }
  0x34   : > { %p2129_p11 = scmp.ne.s32.totalorder %s429_s12, %s2128_s26  ;;  %p2136_p0 = scmp.lt.s32.totalorder %s429_s12, %s429_s12 }
  0x35   : > { %p2137_p2 = scmp.lt.s32.totalorder %s2128_s26, %s2128_s26 }
  0x36   : > { %p2131_p12 = pnand %p2129_p11, %p2581_p6 }
  0x37   : > { %p2138_p4 = por %p2137_p2, %p2136_p0 }
  0x38   : > { %p2132_p13 = pneg %p2131_p12 }
  0x39   : > { %1962 = dma.hbm_to_vmem [thread:$0]  (!%p2575_p5), %s3066_s3, 256, %s403_s29, [#allocation9], %s3046_s15, %s3046_s15, %s3047_s16  }
  0x3a   : > { %p2139_p7 = pnand %p2138_p4, %p2132_p13 }
  0x3c   : > { %2142 = shalt.err (!%p2139_p7)
}
  0x3d   : > { %s3067_s5 = sld [smem:[#allocation34_spill]]  ;;  %s2460_s29 = smov [#allocation7]  }
  0x3e   : > { %s389_s28 = sshll.u32 %s2460_s29, 4  ;;  %s2461_s30 = smov [#allocation10]   ;;  %s390_s28 = int_to_ptr.vmem [resolvable:$true] %s389_s28 }
  0x3f   : > { %s415_s14 = sshll.u32 %s2461_s30, 4  ;;  %s2154_s1 = scalar_lea.vmem %s390_s28, 256  ;;  %s416_s14 = int_to_ptr.vmem [resolvable:$true] %s415_s14 }
  0x40   : > { %p2155_p8 = scmp.ne.s32.totalorder %s390_s28, %s2154_s1  ;;  %p2162_p11 = scmp.lt.s32.totalorder %s390_s28, %s390_s28 }
  0x41   : > { %p2163_p12 = scmp.lt.s32.totalorder %s2154_s1, %s2154_s1 }
  0x42   : > { %p2157_p9 = pnand %p2155_p8, %p2581_p6 }
  0x43   : > { %1968 = dma.hbm_to_vmem [thread:$0]  (!%p2575_p5), %s3067_s5, 256, %s429_s12, [#allocation12], %s3046_s15, %s3046_s15, %s3047_s16  }
  0x44   : > { %p2158_p10 = pneg %p2157_p9  ;;  %p2164_p13 = por %p2163_p12, %p2162_p11 }
  0x46   : > { %p2165_p0 = pnand %p2164_p13, %p2158_p10 }
  0x48   : > { %2168 = shalt.err (!%p2165_p0)
}
  0x49   : > { %s3068_s2 = sld [smem:[#allocation31_spill]]  ;;  %s2180_s25 = scalar_lea.vmem %s416_s14, 256 }
  0x4a   : > { %p2181_p2 = scmp.ne.s32.totalorder %s416_s14, %s2180_s25  ;;  %p2188_p8 = scmp.lt.s32.totalorder %s416_s14, %s416_s14 }
  0x4b   : > { %p2189_p9 = scmp.lt.s32.totalorder %s2180_s25, %s2180_s25 }
  0x4c   : > { %p2183_p4 = pnand %p2181_p2, %p2581_p6 }
  0x4d   : > { %p2190_p10 = por %p2189_p9, %p2188_p8 }
  0x4e   : > { %p2184_p7 = pneg %p2183_p4 }
  0x4f   : > { %1959 = dma.hbm_to_vmem [thread:$0]  (!%p2575_p5), %s3068_s2, 256, %s390_s28, [#allocation6], %s3046_s15, %s3046_s15, %s3047_s16  }
  0x50   : > { %p2191_p11 = pnand %p2190_p10, %p2184_p7 }
  0x52   : > { %2194 = shalt.err (!%p2191_p11)
}
  0x53   : > { %s3069_s4 = sld [smem:[#allocation33_spill]]  ;;  %s2462_s29 = smov [#allocation13]  }
  0x54   : > { %s441_s28 = sshll.u32 %s2462_s29, 4  ;;  %s442_s28 = int_to_ptr.vmem [resolvable:$true] %s441_s28 }
  0x55   : > { %s2206_s30 = scalar_lea.vmem %s442_s28, 256  ;;  %p2214_p2 = scmp.lt.s32.totalorder %s442_s28, %s442_s28 }
  0x56   : > { %p2207_p12 = scmp.ne.s32.totalorder %s442_s28, %s2206_s30  ;;  %p2215_p4 = scmp.lt.s32.totalorder %s2206_s30, %s2206_s30 }
  0x58   : > { %p2209_p13 = pnand %p2207_p12, %p2581_p6  ;;  %p2216_p7 = por %p2215_p4, %p2214_p2 }
  0x59   : > { %1965 = dma.hbm_to_vmem [thread:$0]  (!%p2575_p5), %s3069_s4, 256, %s416_s14, [#allocation9], %s3046_s15, %s3046_s15, %s3047_s16  }
  0x5a   : > { %p2210_p0 = pneg %p2209_p13 }
  0x5c   : > { %p2217_p8 = pnand %p2216_p7, %p2210_p0 }
  0x5e   : > { %2220 = shalt.err (!%p2217_p8)
}
  0x5f   : > { %s3070_s6 = sld [smem:[#allocation35_spill]]  ;;  %s3048_s27 = sadd.s32 4294967294, %s2453_s22  }
  0x60   : > { %s49_s13 = sadd.s32 1, %s2449_s21  ;;  %s58_s26 = sadd.s32 1, %s2441_s19 }
  0x61   : > { %p51_p6 = scmp.ge.s32.totalorder %s49_s13, 6  ;;  %p65_p9 = scmp.ne.s32.totalorder %s2441_s19, %s2437_s18 }
  0x62   : > { %p66_p10 = scmp.eq.s32.totalorder %s2453_s22, 0  ;;  %p71_p12 = scmp.ne.s32.totalorder %s2437_s18, %s2433_s17 }
  0x63   : > { %s3097_s13 = smov (%p51_p6, %s49_s13), 0  ;;  %p239_p4 = scmp.eq.s32.totalorder %s3048_s27, 5 }
  0x64   : > { %3071 = sst [smem:[#allocation28_spill]] %s3097_s13  ;;  %p2653_p11 = por %p66_p10, %p65_p9 }
  0x65   : > { %1971 = dma.hbm_to_vmem [thread:$0]  (!%p2575_p5), %s3070_s6, 256, %s442_s28, [#allocation12], %s3046_s15, %s3046_s15, %s3047_s16  }
  0x66   : > { %s53_s1 = ssub.s32 %s2449_s21, %s3097_s13  ;;  %p233_p5 = scmp.eq.s32.totalorder %s2562_s23, 5 }
  0x67   : > { %p56_p13 = scmp.eq.s32.totalorder %s53_s1, 0  ;;  %p2664_p0 = por %p3050_p1, %p71_p12 }
  0x68   : > { %p2668_p2 = por %p233_p5, %p65_p9  ;;  %p2677_p7 = por %p239_p4, %p71_p12 }
  0x69   : > { %s2675_s28 = scalar_select %p56_p13, %s2441_s19, %s58_s26  }
  0x6a   : > { %p1998_p8 = scmp.lt.s32.totalorder %s2453_s22, 6  ;;  %s455_s12 = sand.u32 1, %s2441_s19  }
  0x6b   : > { %s1791_s14 = sshll.u32 %s2449_s21, 8  ;;  %s1734_s1 = sshll.u32 %s455_s12, 4 }
  0x6c   : > { %s3076_s0 = sld [smem:[#allocation29_spill]]  ;;  %s459_s3 = scalar_lea.vmem [#allocation2], %s1734_s1 }
  0x6d   : > { %s468_s4 = sshll.u32 %s459_s3, 4  ;;  %p2689_p6 = pnand %p1998_p8, %p2653_p11  ;;  %s469_s4 = int_to_ptr.vmem [resolvable:$true] %s468_s4 }
  0x6e   : > { %s456_s26 = scalar_lea.sflag [#allocation3], %s455_s12  ;;  %s2234_s27 = scalar_lea.vmem %s469_s4, 256 }
  0x6f   : > { %p2223_p9 = pneg %p2689_p6  ;;  %p2235_p10 = scmp.ne.s32.totalorder %s469_s4, %s2234_s27 }
  0x70   : > { %s2463_s6 = smov [#allocation2]  }
  0x71   : > { %p2237_p12 = pnand %p2235_p10, %p2223_p9  ;;  %s2239_s13 = sshll.u32 %s2463_s6, 4  ;;  %s2240_s13 = int_to_ptr.vmem [resolvable:$false] %s2239_s13 }
  0x72   : > { %s467_s2 = scalar_lea.hbm %s3076_s0, %s1791_s14  ;;  %s2241_s15 = scalar_lea.vmem %s2240_s13, 512 }
  0x73   : > { %p2238_p5 = pneg %p2237_p12  ;;  %p2242_p13 = scmp.lt.s32.totalorder %s469_s4, %s2240_s13 }
  0x74   : > { %p2243_p4 = scmp.lt.s32.totalorder %s2241_s15, %s2234_s27 }
  0x76   : > { %p2244_p1 = por %p2243_p4, %p2242_p13 }
  0x78   : > { %p2245_p11 = pnand %p2244_p1, %p2238_p5 }
  0x7a   : > { %2248 = shalt.err (!%p2245_p11)
}
  0x7b   : > { %s3078_s3 = smov 8   ;;  %s3079_s16 = smov 128  }
  0x7c   : > { %1975 = dma.hbm_to_vmem [thread:$0]  (!%p2689_p6), %s467_s2, 256, %s469_s4, %s456_s26, %s3079_s16, %s3079_s16, %s3078_s3  }
  0x7d   : > { %480 = sbr.rel (%p2567_p3) target bundleno = 1417 (0x589), region = 48  ;;  %s2703_s25 = sand.u32 (!%p2567_p3), 1, %s2437_s18  }
  0x7e   : > { %s2706_s6 = sshll.u32 (!%p2567_p3), %s2703_s25, 4  ;;  %s483_s27 = scalar_lea.sflag (!%p2567_p3), [#allocation3], %s2703_s25 }
  0x7f   : > { %s486_s13 = scalar_lea.vmem (!%p2567_p3), [#allocation2], %s2706_s6 }
  0x82   : > { %2404 = dma.done.wait (%p2664_p0), %s483_s27, 256  }
  0x83   : > { %2406 = vsyncadd (%p2664_p0), %s483_s27, 4294967040  ;;  %p3080_p1 = scmp.eq.s32.totalorder %s2562_s23, 0 }
  0x85   : > { %2408 = dma.done.wait (%p3080_p1), [#allocation6], 512   ;;  %p3081_p3 = pmov %p3080_p1 }
  0x86   : > { %p3082_p8 = pmov %p3080_p1 }
  0x87   : > { %2410 = vsyncadd (%p3081_p3), [#allocation6], 4294966784 }
  0x88   : > { %2412 = dma.done.wait (%p3082_p8), [#allocation9], 512   ;;  %p3083_p6 = pmov %p3080_p1 }
  0x89   : > { %p3084_p9 = pmov %p3080_p1 }
  0x8a   : > { %2414 = vsyncadd (%p3083_p6), [#allocation9], 4294966784 }
  0x8b   : > { %2416 = dma.done.wait (%p3084_p9), [#allocation12], 512   ;;  %p3085_p10 = pmov %p3080_p1 }
  0x8c   : > { %vm607_vm0 = vcmask 130048   ;;  %v2726_v0 = vld [vmem:[#allocation10 + $0x8] sm:$0xff]  ;;  %v2728_v1 = vld [vmem:[#allocation10] sm:$0xff]  ;;  %v583_v5 = vld [vmem:[#allocation5] sm:$0xff]  ;;  %s2747_s2 = scalar_lea.vmem [#allocation18], %s2706_s6  ;;  %s2752_s4 = scalar_lea.vmem [#allocation20], %s2706_s6 }
  0x8d   : > { %2418 = vsyncadd (%p3085_p10), [#allocation12], 4294966784  ;;  %v577_v2 = vld [vmem:[%s486_s13] sm:$0xff]  ;;  %1829 = vmatprep.subr.msk.mxu0 %vm607_vm0, %v2726_v0  ;;  %v578_v4 = vld [vmem:[%s486_s13 + $0x8] sm:$0xff]  ;;  %s2814_s5 = scalar_lea.vmem [#allocation14], %s2706_s6  ;;  %s3051_s24 = sand.u32 1, %s2562_s23  }
  0x8e   : > { %v579_v3 = vmax.f32 %v577_v2, 0.0  ;;  %1830 = vmatpush3.xpose.msk.msra.mxu0 %vm607_vm0, %v2726_v0  ;;  %v580_v6 = vmax.f32 %v578_v4, 0.0  ;;  %v584_v8 = vld [vmem:[#allocation5 + $0x8] sm:$0xff]  ;;  %v585_v9 = vld [vmem:[#allocation7] sm:$0xff]  ;;  %v586_v13 = vld [vmem:[#allocation7 + $0x8] sm:$0xff]  ;;  %s2829_s9 = sshll.u32 %s2445_s20, 8 }
  0x8f   : > { %1831 = vmatprep.subr.msk.mxu0 %vm607_vm0, %v2728_v1  ;;  %v2762_v34 = vld [vmem:[#allocation8] sm:$0xff]  ;;  %v2767_v35 = vld [vmem:[#allocation8 + $0x8] sm:$0xff]  ;;  %v2778_v38 = vld [vmem:[#allocation13 + $0x8] sm:$0xff]  ;;  %s2835_s1 = scalar_lea.hbm %s3043_s10, %s2829_s9  ;;  %s1424_s26 = sshll.u32 %s2747_s2, 4  ;;  %s2838_s26 = int_to_ptr.vmem [resolvable:$true] %s1424_s26 }
  0x90   : > { %v2736_v7 = vmin.f32 %v579_v3, 1.0  ;;  %v2738_v10 = vmin.f32 %v580_v6, 1.0  ;;  %1840 = vmatprep.mubr.msk.f32.mxu1 %vm607_vm0, %v2762_v34  ;;  %879 = vxpose.xlu0.b32.start [1/2] (short) (narrow) %v2762_v34, 16  ;;  %v2780_v40 = vld [vmem:[#allocation13] sm:$0xff]  ;;  %v2785_v57 = vld [vmem:[#allocation11] sm:$0xff]  ;;  %v2787_v58 = vld [vmem:[#allocation11 + $0x8] sm:$0xff]  ;;  %s2844_s16 = scalar_lea.hbm %s3040_s7, %s2829_s9 }
  0x91   : > { %s2848_s20 = scalar_lea.sflag [#allocation19], %s3051_s24  ;;  %s2249_s27 = scalar_lea.vmem %s2838_s26, 256 }
  0x92   : > { %v595_v11 = vmul.f32 %v583_v5, %v2736_v7  ;;  %v612_v12 = vadd.f32 %v585_v9, %v2736_v7  ;;  %1832 = vmatpush3.xpose.msk.msra.mxu0 %vm607_vm0, %v2728_v1  ;;  %v596_v14 = vmul.f32 %v584_v8, %v2738_v10  ;;  %v613_v15 = vadd.f32 %v586_v13, %v2738_v10  ;;  %p2250_p0 = scmp.ne.s32.totalorder %s2838_s26, %s2249_s27  ;;  %s2464_s13 = smov [#allocation18]  }
  0x93   : > { %v1002_v55 = vmul.f32 255.0, %v2736_v7  ;;  %v1003_v2 = vmul.f32 255.0, %v2738_v10 }
  0x94   : > { %v597_v16 = vmax.f32 %v595_v11, 0.0  ;;  %v614_v17 = vmax.f32 %v612_v12, 0.0  ;;  %v598_v18 = vmax.f32 %v596_v14, 0.0  ;;  %v615_v19 = vmax.f32 %v613_v15, 0.0  ;;  %880 = vxpose.xlu0.b32.end [2/2] (short) (narrow) %v2767_v35, 16  ;;  %p2251_p12 = pnand %p2250_p0, %p2668_p2 }
  0x95   : > { %v1762_v62 = vadd.f32 -128.0, %v1002_v55  ;;  %v1763_v3 = vadd.f32 -128.0, %v1003_v2 }
  0x96   : > { %v599_v20 = vmin.f32 %v597_v16, 1.0  ;;  %v616_v21 = vmin.f32 %v614_v17, 1.0  ;;  %v600_v22 = vmin.f32 %v598_v18, 1.0  ;;  %v617_v23 = vmin.f32 %v615_v19, 1.0  ;;  %p2252_p5 = pneg %p2251_p12 }
  0x98   : > { %v601_v24 = vadd.f32 %v599_v20, %v585_v9  ;;  %610 = vst.msk [vmem:[%s2747_s2] sm:$0xff] %vm607_vm0, %v599_v20  ;;  %618 = vst.msk [vmem:[%s2752_s4] sm:$0xff] %vm607_vm0, %v616_v21  ;;  %v602_v25 = vadd.f32 %v600_v22, %v586_v13 }
  0x99   : > { %611 = vst.msk [vmem:[%s2747_s2 + $0x8] sm:$0xff] %vm607_vm0, %v600_v22  ;;  %619 = vst.msk [vmem:[%s2752_s4 + $0x8] sm:$0xff] %vm607_vm0, %v617_v23  ;;  %s2253_s2 = sshll.u32 %s2464_s13, 4  ;;  %s2254_s2 = int_to_ptr.vmem [resolvable:$false] %s2253_s2 }
  0x9a   : > { %v603_v26 = vmax.f32 %v601_v24, 0.0  ;;  %v604_v27 = vmax.f32 %v602_v25, 0.0  ;;  %s2255_s12 = scalar_lea.vmem %s2254_s2, 512  ;;  %p2256_p13 = scmp.lt.s32.totalorder %s2838_s26, %s2254_s2 }
  0x9b   : > { %p2257_p4 = scmp.lt.s32.totalorder %s2255_s12, %s2249_s27 }
  0x9c   : > { %v605_v28 = vmin.f32 %v603_v26, 1.0  ;;  %v606_v29 = vmin.f32 %v604_v27, 1.0 }
  0x9d   : > { %p2258_p11 = por %p2257_p4, %p2256_p13 }
  0x9e   : > { %v620_v30 = vmul.f32 255.0, %v605_v28  ;;  %v621_v31 = vmul.f32 255.0, %v606_v29 }
  0x9f   : > { %p2259_p1 = pnand %p2258_p11, %p2252_p5 }
  0xa0   : > { %v1750_v32 = vadd.f32 -128.0, %v620_v30  ;;  %v1751_v33 = vadd.f32 -128.0, %v621_v31 }
  0xa2   : > { %1833 = vmatprep.mubr.msk.f32.mxu0 %vm607_vm0, %v1750_v32 }
  0xa3   : > { %1834 = vmatmul.mubr.msk.f32.vlgmr.msra.gmra.mxu0 %vm607_vm0, %v1751_v33 }
 0x10c   : > { %v895_v4 = vpop.trf.xlu0 }
 0x10d   : > { %1854 = vmatprep.mubr.msk.f32.mxu0 %vm607_vm0, %v895_v4 }
 0x110   : > { %v896_v8 = vpop.trf.xlu0 }
 0x163   : > { %v1835_v36 = vpop.f32.mrf.mxu0 }
 0x164   : > { %1836 = vmatprep.subr.mxu1 %v1835_v36 }
 0x165   : > { %v702_v37 = vpop.f32.mrf.mxu0  ;;  %1837 = vmatpush3.msra.mxu1 %v1835_v36 }
 0x166   : > { %1838 = vmatprep.subr.mxu1 %v702_v37 }
 0x167   : > { %1839 = vmatpush3.msra.mxu1 %v702_v37 }
 0x168   : > { %1841 = vmatmul.mubr.msk.f32.vlgmr.msra.gmra.mxu1 %vm607_vm0, %v2767_v35  ;;  %1843 = vmatprep.subr.mxu1 %v2726_v0 }
 0x169   : > { %1844 = vmatpush3.msra.mxu1 %v2726_v0 }
 0x16a   : > { %1845 = vmatprep.subr.mxu1 %v2728_v1 }
 0x16b   : > { %1846 = vmatpush3.msra.mxu1 %v2728_v1 }
 0x16c   : > { %1857 = vmatprep.subr.msk.mxu1 %vm607_vm0, %v2726_v0 }
 0x228   : > { %v1842_v39 = vpop.f32.mrf.mxu1 }
 0x229   : > { %v793_v41 = vmul.f32 %v1842_v39, %v2778_v38 }
 0x22a   : > { %v783_v42 = vpop.f32.mrf.mxu1 }
 0x22b   : > { %v1895_v43 = vcvt.f32.s32 %v793_v41  ;;  %v792_v44 = vmul.f32 %v783_v42, %v2780_v40  ;;  %v1893_v47 = vand.u32 2147483647, %v793_v41  ;;  %v1898_v49 = vand.u32 2147483648, %v793_v41 }
 0x22d   : > { %v1896_v45 = vcvt.s32.f32 %v1895_v43  ;;  %v1887_v46 = vcvt.f32.s32 %v792_v44  ;;  %v1885_v51 = vand.u32 2147483647, %v792_v44  ;;  %v1890_v54 = vand.u32 2147483648, %v792_v44 }
 0x22e   : > { %vm1894_vm1 = vcmp.lt.f32.partialorder %v1893_v47, 8388608.0 }
 0x22f   : > { %v1897_v48 = vand.u32 2147483647, %v1896_v45  ;;  %v1888_v50 = vcvt.s32.f32 %v1887_v46  ;;  %vm1886_vm2 = vcmp.lt.f32.partialorder %v1885_v51, 8388608.0 }
 0x231   : > { %v1899_v52 = vor.u32 %v1898_v49, %v1897_v48  ;;  %v1889_v53 = vand.u32 2147483647, %v1888_v50 }
 0x233   : > { %v1891_v56 = vor.u32 %v1890_v54, %v1889_v53  ;;  %v1900_v59 = vsel %vm1894_vm1, %v1899_v52, %v793_v41 }
 0x234   : > { %v797_v63 = vmul.f32 %v1900_v59, %v2787_v58 }
 0x235   : > { %v1892_v60 = vsel %vm1886_vm2, %v1891_v56, %v792_v44 }
 0x236   : > { %v796_v61 = vmul.f32 %v1892_v60, %v2785_v57 }
 0x238   : > { %1847 = vmatprep.mubr.msk.f32.mxu1 %vm607_vm0, %v796_v61 }
 0x239   : > { %1848 = vmatmul.mubr.msk.f32.vlgmr.msra.gmra.mxu1 %vm607_vm0, %v797_v63 }
 0x23a   : > { %1858 = vmatpush3.xpose.msk.msra.mxu1 %vm607_vm0, %v2726_v0  ;;  %1861 = vmatprep.mubr.msk.f32.mxu1 %vm607_vm0, %v1762_v62 }
 0x23b   : > { %1859 = vmatprep.subr.msk.mxu1 %vm607_vm0, %v2728_v1 }
 0x23e   : > { %1860 = vmatpush3.xpose.msk.msra.mxu1 %vm607_vm0, %v2728_v1 }
 0x241   : > { %1862 = vmatmul.mubr.msk.f32.vlgmr.msra.gmra.mxu1 %vm607_vm0, %v1763_v3 }
 0x242   : > { %1882 = vmatprep.mubr.msk.f32.mxu1 %vm607_vm0, %v895_v4 }
 0x2f9   : > { %v1849_v5 = vpop.f32.mrf.mxu1 }
 0x2fa   : > { %1850 = vmatprep.subr.mxu0 %v1849_v5 }
 0x2fb   : > { %v870_v6 = vpop.f32.mrf.mxu1  ;;  %1851 = vmatpush3.msra.mxu0 %v1849_v5 }
 0x2fc   : > { %1852 = vmatprep.subr.mxu0 %v870_v6 }
 0x2fd   : > { %1853 = vmatpush3.msra.mxu0 %v870_v6 }
 0x2fe   : > { %1855 = vmatmul.mubr.msk.f32.vlgmr.msra.gmra.mxu0 %vm607_vm0, %v896_v8 }
 0x2ff   : > { %1868 = vmatprep.mubr.msk.f32.mxu0 %vm607_vm0, %v2762_v34 }
 0x301   : > { %v1863_v9 = vpop.f32.mrf.mxu1 }
 0x302   : > { %1864 = vmatprep.subr.mxu0 %v1863_v9 }
 0x303   : > { %v1078_v11 = vpop.f32.mrf.mxu1  ;;  %1865 = vmatpush3.msra.mxu0 %v1863_v9 }
 0x304   : > { %1866 = vmatprep.subr.mxu0 %v1078_v11 }
 0x305   : > { %1867 = vmatpush3.msra.mxu0 %v1078_v11 }
 0x306   : > { %1869 = vmatmul.mubr.msk.f32.vlgmr.msra.gmra.mxu0 %vm607_vm0, %v2767_v35  ;;  %1871 = vmatprep.subr.mxu0 %v2726_v0 }
 0x307   : > { %1872 = vmatpush3.msra.mxu0 %v2726_v0 }
 0x308   : > { %1873 = vmatprep.subr.mxu0 %v2728_v1 }
 0x309   : > { %1874 = vmatpush3.msra.mxu0 %v2728_v1 }
 0x3be   : > { %v1856_v12 = vpop.f32.mrf.mxu0 }
 0x3bf   : > { %v993_v13 = vmul.f32 0.003921569, %v1856_v12 }
 0x3c0   : > { %v983_v14 = vpop.f32.mrf.mxu0 }
 0x3c1   : > { %v995_v15 = vadd.f32 0.5019608, %v993_v13  ;;  %v992_v16 = vmul.f32 0.003921569, %v983_v14 }
 0x3c3   : > { %v997_v17 = vmax.f32 %v995_v15, 0.0  ;;  %v994_v18 = vadd.f32 0.5019608, %v992_v16 }
 0x3c5   : > { %v999_v19 = vmin.f32 %v997_v17, 1.0  ;;  %v996_v20 = vmax.f32 %v994_v18, 0.0 }
 0x3c6   : > { %v1870_v21 = vpop.f32.mrf.mxu0 }
 0x3c7   : > { %1001 = vst.msk [vmem:[%s2814_s5 + $0x8] sm:$0xff] %vm607_vm0, %v999_v19  ;;  %v998_v0 = vmin.f32 %v996_v20, 1.0  ;;  %v1163_v22 = vmul.f32 %v1870_v21, %v2778_v38 }
 0x3c8   : > { %v1153_v1 = vpop.f32.mrf.mxu0 }
 0x3c9   : > { %1000 = vst.msk [vmem:[%s2814_s5] sm:$0xff] %vm607_vm0, %v998_v0  ;;  %v1911_v23 = vcvt.f32.s32 %v1163_v22  ;;  %v1162_v24 = vmul.f32 %v1153_v1, %v2780_v40  ;;  %v1909_v27 = vand.u32 2147483647, %v1163_v22  ;;  %v1914_v29 = vand.u32 2147483648, %v1163_v22 }
 0x3cb   : > { %v1912_v25 = vcvt.s32.f32 %v1911_v23  ;;  %v1903_v26 = vcvt.f32.s32 %v1162_v24  ;;  %v1901_v31 = vand.u32 2147483647, %v1162_v24  ;;  %v1906_v34 = vand.u32 2147483648, %v1162_v24 }
 0x3cc   : > { %vm1910_vm3 = vcmp.lt.f32.partialorder %v1909_v27, 8388608.0 }
 0x3cd   : > { %v1913_v28 = vand.u32 2147483647, %v1912_v25  ;;  %v1904_v30 = vcvt.s32.f32 %v1903_v26  ;;  %vm1902_vm4 = vcmp.lt.f32.partialorder %v1901_v31, 8388608.0 }
 0x3cf   : > { %v1915_v32 = vor.u32 %v1914_v29, %v1913_v28  ;;  %v1905_v33 = vand.u32 2147483647, %v1904_v30 }
 0x3d1   : > { %v1907_v35 = vor.u32 %v1906_v34, %v1905_v33  ;;  %v1916_v36 = vsel %vm1910_vm3, %v1915_v32, %v1163_v22 }
 0x3d2   : > { %v1167_v39 = vmul.f32 %v1916_v36, %v2787_v58 }
 0x3d3   : > { %v1908_v37 = vsel %vm1902_vm4, %v1907_v35, %v1162_v24 }
 0x3d4   : > { %v1166_v38 = vmul.f32 %v1908_v37, %v2785_v57 }
 0x3d6   : > { %1875 = vmatprep.mubr.msk.f32.mxu0 %vm607_vm0, %v1166_v38 }
 0x3d7   : > { %1876 = vmatmul.mubr.msk.f32.vlgmr.msra.gmra.mxu0 %vm607_vm0, %v1167_v39 }
 0x497   : > { %v1877_v40 = vpop.f32.mrf.mxu0 }
 0x498   : > { %1878 = vmatprep.subr.mxu1 %v1877_v40 }
 0x499   : > { %v1240_v41 = vpop.f32.mrf.mxu0  ;;  %1879 = vmatpush3.msra.mxu1 %v1877_v40 }
 0x49a   : > { %1880 = vmatprep.subr.mxu1 %v1240_v41 }
 0x49b   : > { %1881 = vmatpush3.msra.mxu1 %v1240_v41 }
 0x49c   : > { %1883 = vmatmul.mubr.msk.f32.vlgmr.msra.gmra.mxu1 %vm607_vm0, %v896_v8 }
 0x49d   : > { %2262 = shalt.err (!%p2259_p1)
}
 0x49e   : > { %s2263_s14 = scalar_lea.hbm %s2835_s1, 256  ;;  %s2267_s13 = scalar_lea.hbm %s3043_s10, 1536 }
 0x49f   : > { %p2264_p3 = scmp.ne.s32.totalorder %s2835_s1, %s2263_s14  ;;  %p2268_p9 = scmp.lt.s32.totalorder %s2835_s1, %s3043_s10 }
 0x4a0   : > { %p2269_p10 = scmp.lt.s32.totalorder %s2267_s13, %s2263_s14 }
 0x4a1   : > { %p2265_p8 = pnand %p2264_p3, %p2668_p2 }
 0x4a2   : > { %p2270_p0 = por %p2269_p10, %p2268_p9 }
 0x4a3   : > { %p2266_p6 = pneg %p2265_p8 }
 0x4a5   : > { %p2271_p12 = pnand %p2270_p0, %p2266_p6 }
 0x4a7   : > { %2274 = shalt.err (!%p2271_p12)
}
 0x4a8   : > { %s3052_s27 = smov 128   ;;  %s2466_s2 = smov 8  }
 0x4a9   : > { %1946 = dma.vmem_to_hbm [thread:$0]  (%p2668_p2), %s2838_s26, 256, %s2835_s1, %s2848_s20, %s3052_s27, %s3052_s27, %s2466_s2  }
 0x4aa   : > { %s1370_s0 = sshll.u32 %s2814_s5, 4  ;;  %s2878_s24 = scalar_lea.vmem [#allocation17], %s2706_s6  ;;  %s2875_s0 = int_to_ptr.vmem [resolvable:$true] %s1370_s0 }
 0x4ab   : > { %608 = vst.msk [vmem:[%s2878_s24] sm:$0xff] %vm607_vm0, %v2736_v7  ;;  %609 = vst.msk [vmem:[%s2878_s24 + $0x8] sm:$0xff] %vm607_vm0, %v2738_v10  ;;  %s1335_s12 = scalar_lea.sflag [#allocation4], %s2703_s25  ;;  %s2275_s14 = scalar_lea.vmem %s2875_s0, 256 }
 0x4ac   : > { %p2276_p5 = scmp.ne.s32.totalorder %s2875_s0, %s2275_s14  ;;  %s2467_s5 = smov [#allocation14]  }
 0x4ad   : > { %s2279_s1 = sshll.u32 %s2467_s5, 4  ;;  %s2280_s1 = int_to_ptr.vmem [resolvable:$false] %s2279_s1 }
 0x4ae   : > { %p2277_p13 = pnand %p2276_p5, %p2668_p2  ;;  %s2281_s26 = scalar_lea.vmem %s2280_s1, 512 }
 0x4af   : > { %p2282_p11 = scmp.lt.s32.totalorder %s2875_s0, %s2280_s1  ;;  %p2283_p1 = scmp.lt.s32.totalorder %s2281_s26, %s2275_s14 }
 0x4b0   : > { %p2278_p4 = pneg %p2277_p13 }
 0x4b1   : > { %p2284_p3 = por %p2283_p1, %p2282_p11 }
 0x4b3   : > { %p2285_p8 = pnand %p2284_p3, %p2278_p4 }
 0x4b5   : > { %2288 = shalt.err (!%p2285_p8)
}
 0x4b6   : > { %s2289_s15 = scalar_lea.hbm %s2844_s16, 256  ;;  %s2293_s13 = scalar_lea.hbm %s3040_s7, 1536 }
 0x4b7   : > { %p2290_p6 = scmp.ne.s32.totalorder %s2844_s16, %s2289_s15  ;;  %p2294_p0 = scmp.lt.s32.totalorder %s2844_s16, %s3040_s7 }
 0x4b8   : > { %p2295_p12 = scmp.lt.s32.totalorder %s2293_s13, %s2289_s15 }
 0x4b9   : > { %p2291_p9 = pnand %p2290_p6, %p2668_p2 }
 0x4ba   : > { %p2296_p5 = por %p2295_p12, %p2294_p0 }
 0x4bb   : > { %p2292_p10 = pneg %p2291_p9 }
 0x4bd   : > { %p2297_p13 = pnand %p2296_p5, %p2292_p10 }
 0x4bf   : > { %2300 = shalt.err (!%p2297_p13)
}
 0x4c0   : > { %s3086_s14 = smov 128   ;;  %s2914_s27 = scalar_lea.hbm %s3044_s11, %s2829_s9 }
 0x4c1   : > { %1943 = dma.vmem_to_hbm [thread:$0]  (%p2668_p2), %s2875_s0, 256, %s2844_s16, %s1335_s12, %s3086_s14, %s3086_s14, %s2466_s2  }
 0x4c2   : > { %s1442_s15 = sshll.u32 %s2752_s4, 4  ;;  %s2468_s3 = smov [#allocation20]   ;;  %s1443_s15 = int_to_ptr.vmem [resolvable:$true] %s1442_s15 }
 0x4c3   : > { %s2301_s25 = scalar_lea.vmem %s1443_s15, 256  ;;  %s2305_s13 = sshll.u32 %s2468_s3, 4  ;;  %s2306_s13 = int_to_ptr.vmem [resolvable:$false] %s2305_s13 }
 0x4c4   : > { %p2302_p4 = scmp.ne.s32.totalorder %s1443_s15, %s2301_s25  ;;  %s2307_s5 = scalar_lea.vmem %s2306_s13, 512 }
 0x4c5   : > { %p2308_p3 = scmp.lt.s32.totalorder %s1443_s15, %s2306_s13  ;;  %p2309_p8 = scmp.lt.s32.totalorder %s2307_s5, %s2301_s25 }
 0x4c6   : > { %p2303_p11 = pnand %p2302_p4, %p2668_p2 }
 0x4c7   : > { %p2310_p6 = por %p2309_p8, %p2308_p3 }
 0x4c8   : > { %p2304_p1 = pneg %p2303_p11 }
 0x4ca   : > { %p2311_p9 = pnand %p2310_p6, %p2304_p1 }
 0x4cc   : > { %2314 = shalt.err (!%p2311_p9)
}
 0x4cd   : > { %s2315_s4 = scalar_lea.hbm %s2914_s27, 256  ;;  %s2319_s12 = scalar_lea.hbm %s3044_s11, 1536 }
 0x4ce   : > { %p2316_p10 = scmp.ne.s32.totalorder %s2914_s27, %s2315_s4  ;;  %p2320_p5 = scmp.lt.s32.totalorder %s2914_s27, %s3044_s11 }
 0x4cf   : > { %p2321_p13 = scmp.lt.s32.totalorder %s2319_s12, %s2315_s4 }
 0x4d0   : > { %p2317_p0 = pnand %p2316_p10, %p2668_p2 }
 0x4d1   : > { %p2322_p4 = por %p2321_p13, %p2320_p5 }
 0x4d2   : > { %p2318_p12 = pneg %p2317_p0 }
 0x4d4   : > { %p2323_p11 = pnand %p2322_p4, %p2318_p12 }
 0x4d6   : > { %2326 = shalt.err (!%p2323_p11)
}
 0x4d7   : > { %1947 = dma.vmem_to_hbm [thread:$0]  (%p2668_p2), %s1443_s15, 256, %s2914_s27, %s2848_s20, %s3086_s14, %s3086_s14, %s2466_s2  }
 0x4d8   : > { %s547_s25 = scalar_lea.vmem [#allocation15], %s2706_s6  ;;  %s1406_s13 = sshll.u32 %s2878_s24, 4  ;;  %s2954_s13 = int_to_ptr.vmem [resolvable:$true] %s1406_s13 }
 0x4d9   : > { %s1388_s3 = sshll.u32 %s547_s25, 4  ;;  %s2944_s27 = scalar_lea.hbm %s3041_s8, %s2829_s9  ;;  %s2946_s3 = int_to_ptr.vmem [resolvable:$true] %s1388_s3 }
 0x4da   : > { %s3087_s16 = sld [smem:[#allocation36_spill]]  ;;  %s3088_s24 = sand.u32 1, %s2562_s23  }
 0x4db   : > { %s2959_s0 = scalar_lea.sflag [#allocation16], %s3088_s24  ;;  %s2327_s12 = scalar_lea.vmem %s2946_s3, 256 }
 0x4dc   : > { %p2328_p1 = scmp.ne.s32.totalorder %s2946_s3, %s2327_s12  ;;  %s2469_s1 = smov [#allocation15]  }
 0x4dd   : > { %s2331_s26 = sshll.u32 %s2469_s1, 4  ;;  %s2332_s26 = int_to_ptr.vmem [resolvable:$false] %s2331_s26 }
 0x4de   : > { %p2329_p3 = pnand %p2328_p1, %p2668_p2  ;;  %s2333_s5 = scalar_lea.vmem %s2332_s26, 512 }
 0x4df   : > { %p2334_p6 = scmp.lt.s32.totalorder %s2946_s3, %s2332_s26  ;;  %p2335_p9 = scmp.lt.s32.totalorder %s2333_s5, %s2327_s12 }
 0x4e0   : > { %s2952_s6 = scalar_lea.hbm %s3087_s16, %s2829_s9  ;;  %p2330_p8 = pneg %p2329_p3 }
 0x4e1   : > { %p2336_p10 = por %p2335_p9, %p2334_p6 }
 0x4e3   : > { %p2337_p0 = pnand %p2336_p10, %p2330_p8 }
 0x55c   : > { %v1884_v7 = vpop.f32.mrf.mxu1 }
 0x55d   : > { %v1325_v10 = vmul.f32 0.003921569, %v1884_v7 }
 0x55e   : > { %v1315_v42 = vpop.f32.mrf.mxu1 }
 0x55f   : > { %v1327_v43 = vadd.f32 0.5019608, %v1325_v10  ;;  %v1324_v44 = vmul.f32 0.003921569, %v1315_v42 }
 0x561   : > { %v1329_v45 = vmax.f32 %v1327_v43, 0.0  ;;  %v1326_v46 = vadd.f32 0.5019608, %v1324_v44 }
 0x563   : > { %v1331_v47 = vmin.f32 %v1329_v45, 1.0  ;;  %v1328_v48 = vmax.f32 %v1326_v46, 0.0 }
 0x565   : > { %1333 = vst.msk [vmem:[%s547_s25 + $0x8] sm:$0xff] %vm607_vm0, %v1331_v47  ;;  %v1330_v49 = vmin.f32 %v1328_v48, 1.0 }
 0x567   : > { %1332 = vst.msk [vmem:[%s547_s25] sm:$0xff] %vm607_vm0, %v1330_v49 }
 0x568   : > { %2340 = shalt.err (!%p2337_p0)
}
 0x569   : > { %s2341_s23 = scalar_lea.hbm %s2944_s27, 256  ;;  %s2345_s20 = scalar_lea.hbm %s3041_s8, 1536 }
 0x56a   : > { %p2342_p12 = scmp.ne.s32.totalorder %s2944_s27, %s2341_s23  ;;  %p2346_p4 = scmp.lt.s32.totalorder %s2944_s27, %s3041_s8 }
 0x56b   : > { %p2347_p11 = scmp.lt.s32.totalorder %s2345_s20, %s2341_s23 }
 0x56c   : > { %p2343_p5 = pnand %p2342_p12, %p2668_p2 }
 0x56d   : > { %p2348_p1 = por %p2347_p11, %p2346_p4 }
 0x56e   : > { %p2344_p13 = pneg %p2343_p5 }
 0x570   : > { %p2349_p3 = pnand %p2348_p1, %p2344_p13 }
 0x572   : > { %2352 = shalt.err (!%p2349_p3)
}
 0x573   : > { %1944 = dma.vmem_to_hbm [thread:$0]  (%p2668_p2), %s2946_s3, 256, %s2944_s27, %s2959_s0, %s3086_s14, %s3086_s14, %s2466_s2  }
 0x574   : > { %s2353_s24 = scalar_lea.vmem %s2954_s13, 256  ;;  %s2470_s12 = smov [#allocation17]  }
 0x575   : > { %p2354_p8 = scmp.ne.s32.totalorder %s2954_s13, %s2353_s24  ;;  %s2357_s1 = sshll.u32 %s2470_s12, 4  ;;  %s2358_s1 = int_to_ptr.vmem [resolvable:$false] %s2357_s1 }
 0x576   : > { %s2359_s26 = scalar_lea.vmem %s2358_s1, 512  ;;  %p2360_p10 = scmp.lt.s32.totalorder %s2954_s13, %s2358_s1 }
 0x577   : > { %p2355_p6 = pnand %p2354_p8, %p2668_p2  ;;  %p2361_p0 = scmp.lt.s32.totalorder %s2359_s26, %s2353_s24 }
 0x579   : > { %p2356_p9 = pneg %p2355_p6  ;;  %p2362_p12 = por %p2361_p0, %p2360_p10 }
 0x57b   : > { %p2363_p5 = pnand %p2362_p12, %p2356_p9 }
 0x57d   : > { %2366 = shalt.err (!%p2363_p5)
}
 0x57e   : > { %s2367_s5 = scalar_lea.hbm %s2952_s6, 256  ;;  %s2371_s23 = scalar_lea.hbm %s3087_s16, 1536 }
 0x57f   : > { %p2368_p13 = scmp.ne.s32.totalorder %s2952_s6, %s2367_s5  ;;  %p2372_p1 = scmp.lt.s32.totalorder %s2952_s6, %s3087_s16 }
 0x580   : > { %p2373_p3 = scmp.lt.s32.totalorder %s2371_s23, %s2367_s5 }
 0x581   : > { %p2369_p4 = pnand %p2368_p13, %p2668_p2 }
 0x582   : > { %p2374_p8 = por %p2373_p3, %p2372_p1 }
 0x583   : > { %p2370_p11 = pneg %p2369_p4 }
 0x585   : > { %p2375_p6 = pnand %p2374_p8, %p2370_p11 }
 0x587   : > { %2378 = shalt.err (!%p2375_p6)
}
 0x588   : > { %1945 = dma.vmem_to_hbm [thread:$0]  (%p2668_p2), %s2954_s13, 256, %s2952_s6, %s2959_s0, %s3086_s14, %s3086_s14, %s2466_s2  }
 0x589 PF: > { %p2005_p9 = scmp.ge.s32.totalorder %s2453_s22, 2  ;;  %s1457_s20 = sand.u32 1, %s2433_s17  }
 0x58a   : > { %s1458_s15 = scalar_lea.sflag [#allocation4], %s1457_s20 }
 0x58b   : > { %p1977_p10 = pnand %p2005_p9, %p2677_p7 }
 0x58d   : > { %p1978_p0 = pneg %p1977_p10 }
 0x58f   : > { %2420 = dma.done.wait (%p1978_p0), %s1458_s15, 256  }
 0x590   : > { %2422 = vsyncadd (%p1978_p0), %s1458_s15, 4294967040  ;;  %s3089_s29 = sadd.s32 4294967294, %s2453_s22  }
 0x591   : > { %s1466_s4 = sand.u32 1, %s3089_s29  }
 0x592   : > { %s1467_s24 = scalar_lea.sflag [#allocation16], %s1466_s4 }
 0x593   : > { %2424 = dma.done.wait (%p1978_p0), %s1467_s24, 512  }
 0x594   : > { %2426 = vsyncadd (%p1978_p0), %s1467_s24, 4294966784  ;;  %s1485_s12 = scalar_lea.sflag [#allocation19], %s1466_s4 }
 0x595   : > { %2428 = dma.done.wait (%p1978_p0), %s1485_s12, 512  }
 0x596   : > { %2430 = vsyncadd (%p1978_p0), %s1485_s12, 4294966784  ;;  %s37_s22 = sadd.s32 1, %s2453_s22   ;;  %s3090_s30 = sld [smem:[#allocation28_spill]] }
 0x597   : > { %p34_p2 = scmp.ge.s32.totalorder %s37_s22, 8   ;;  %s3091_s17 = smov %s2437_s18 }
 0x598   : > { %s3092_s18 = smov %s2441_s19  ;;  %s3093_s19 = smov %s2675_s28 }
 0x599   : > { %s3094_s20 = smov %s2449_s21  ;;  %36 = sbr.rel (!%p34_p2) target bundleno = 22 (0x16), region = 183 }
 0x59c   : > { %s3095_s21 = smov %s3090_s30 }
 0x59e   :  { %1499 = vsyncpa [#allocation3], 1 }
 0x59f   :  { %1501 = vsyncpa [#allocation3 + $0x1], 1 }
 0x5a0   :  { %1502 = vsyncpa [#allocation6], 1 }
 0x5a1   :  { %1503 = vsyncpa [#allocation9], 1 }
 0x5a2   :  { %1504 = vsyncpa [#allocation12], 1 }
 0x5a3   :  { %1505 = vsyncpa [#allocation4], 1 }
 0x5a4   :  { %1507 = vsyncpa [#allocation4 + $0x1], 1 }
 0x5a5   :  { %1508 = vsyncpa [#allocation16], 1 }
 0x5a6   :  { %1510 = vsyncpa [#allocation16 + $0x1], 1 }
 0x5a7   :  { %1511 = vsyncpa [#allocation19], 1 }
 0x5a8   :  { %1513 = vsyncpa [#allocation19 + $0x1], 1 }

</bundles_post_ra>
